<compile_context>
chip_gen: v7x
topology: tpu7x:2x2x1
jax: 0.10.0
libtpu: 0.0.40
codegen_flags: <defaults>
</compile_context>

<pallas_src>
from functools import partial

import jax
import jax.numpy as jnp
from jax.experimental import pallas as pl
from jax.experimental.pallas import tpu as pltpu


# ----------------------------------------------------------------------------
# Generic helpers
# ----------------------------------------------------------------------------
def _round_up(x, m):
    return ((x + m - 1) // m) * m


def _device_kind():
    try:
        return jax.devices()[0].device_kind.lower()
    except Exception:  # pragma: no cover - defensive
        return ""


def _tile_for(dim, target, step):
    """Choose (tile, padded_dim) for one axis.

    dim <= target        -> single full-dim block (always legal), no padding.
    dim >  target        -> pad dim to a multiple of `step`, pick the largest
                            multiple of `step` <= target dividing the padded dim.
    """
    if dim <= target:
        return dim, dim
    padded = _round_up(dim, step)
    t = max(step, (target // step) * step)
    while t >= step:
        if padded % t == 0:
            return t, padded
        t -= step
    return step, padded


def _default_linear_tiles():
    """(tm, tn, tk) targets per TPU generation (fit default scoped VMEM)."""
    kind = _device_kind()
    if "v5" in kind:
        return 512, 256, 512       # ~4.5 MiB double-buffered < 16 MiB scoped
    if "v6" in kind:
        return 512, 512, 1024      # ~11 MiB double-buffered < 32 MiB scoped
    if "v7" in kind:
        return 512, 512, 512       # ~7 MiB double-buffered, 64 MiB physical
    return 512, 256, 512


# ----------------------------------------------------------------------------
# Kernel 1: tiled dense layer   y = x @ W_t + b     (W_t stored as (Din, Dout))
# ----------------------------------------------------------------------------
def _linear_kernel(x_ref, w_ref, b_ref, o_ref, acc_ref):
    k = pl.program_id(2)

    @pl.when(k == 0)
    def _init():
        acc_ref[...] = jnp.zeros(acc_ref.shape, jnp.float32)

    acc_ref[...] += jnp.dot(x_ref[...], w_ref[...],
                            preferred_element_type=jnp.float32)

    @pl.when(k == pl.num_programs(2) - 1)
    def _finalize():
        o_ref[...] = (acc_ref[...] + b_ref[...].astype(jnp.float32)
                      ).astype(o_ref.dtype)


def linear_pallas(x2d, w_t, b, *, tiles=None):
    """x2d: (M, Din); w_t: (Din, Dout) pre-transposed; b: (Dout,) -> (M, Dout)."""
    M, K = x2d.shape
    Kw, N = w_t.shape
    assert K == Kw
    if tiles is None:
        tiles = _default_linear_tiles()

    tm, Mp = _tile_for(M, tiles[0], 8)
    tn, Np = _tile_for(N, tiles[1], 128)
    tk, Kp = _tile_for(K, tiles[2], 128)

    # Zero-pad to tile multiples (zero K columns contribute nothing to the dot).
    xp = x2d if (Mp == M and Kp == K) else jnp.pad(x2d, ((0, Mp - M), (0, Kp - K)))
    wp = w_t if (Kp == K and Np == N) else jnp.pad(w_t, ((0, Kp - K), (0, Np - N)))
    bp = b if Np == N else jnp.pad(b, (0, Np - N))

    grid = (Mp // tm, Np // tn, Kp // tk)

    out = pl.pallas_call(
        _linear_kernel,
        out_shape=jax.ShapeDtypeStruct((Mp, Np), x2d.dtype),
        grid_spec=pltpu.PrefetchScalarGridSpec(
            num_scalar_prefetch=0,
            grid=grid,
            in_specs=[
                pl.BlockSpec((tm, tk), lambda i, j, k: (i, k)),
                pl.BlockSpec((tk, tn), lambda i, j, k: (k, j)),
                pl.BlockSpec((1, tn), lambda i, j, k: (0, j)),
            ],
            out_specs=pl.BlockSpec((tm, tn), lambda i, j, k: (i, j)),
            scratch_shapes=[pltpu.VMEM((tm, tn), jnp.float32)],
        ),
        compiler_params=pltpu.CompilerParams(
            dimension_semantics=("parallel", "parallel", "arbitrary")),
    )(xp, wp, bp.reshape(1, Np))

    if Mp != M or Np != N:
        out = out[:M, :N]
    return out


# ----------------------------------------------------------------------------
# Kernel 2: flash-style multi-head attention (online softmax over KV tiles)
# ----------------------------------------------------------------------------
def _flash_attn_kernel(q_ref, k_ref, v_ref, o_ref, m_sc, l_sc, acc_sc, *,
                       num_heads, head_dim, causal, q_tile, kv_tile, s_valid):
    qi = pl.program_id(1)
    kv = pl.program_id(2)
    H, hd = num_heads, head_dim
    scale = 1.0 / (head_dim ** 0.5)
    NEG = -1e30  # finite mask value (safe with online softmax)

    @pl.when(kv == 0)
    def _init():
        m_sc[...] = jnp.full(m_sc.shape, NEG, jnp.float32)
        l_sc[...] = jnp.zeros(l_sc.shape, jnp.float32)
        acc_sc[...] = jnp.zeros(acc_sc.shape, jnp.float32)

    def _update(apply_causal):
        mask = None
        if apply_causal or (s_valid is not None):
            col = jax.lax.broadcasted_iota(jnp.int32, (q_tile, kv_tile), 1) \
                + kv * kv_tile
            if apply_causal:
                row = jax.lax.broadcasted_iota(jnp.int32, (q_tile, kv_tile), 0) \
                    + qi * q_tile
                mask = col <= row
            if s_valid is not None:          # mask zero-padded KV columns
                pad_ok = col < s_valid
                mask = pad_ok if mask is None else jnp.logical_and(mask, pad_ok)

        pv_parts = []
        alpha_parts = []
        for h in range(H):                   # static unroll over heads
            sl = pl.ds(h * hd, hd)
            q_h = q_ref[0, :, sl] * scale    # native dtype (weak-typed scale)
            k_h = k_ref[0, :, sl]
            v_h = v_ref[0, :, sl]

            # QK^T contracting the last dim of both operands (no transpose).
            s = jax.lax.dot_general(q_h, k_h, (((1,), (1,)), ((), ())),
                                    preferred_element_type=jnp.float32)
            if mask is not None:
                s = jnp.where(mask, s, NEG)

            m_prev = m_sc[h]                 # (tq, 1)
            m_new = jnp.maximum(m_prev, jnp.max(s, axis=-1, keepdims=True))
            alpha = jnp.exp(m_prev - m_new)
            p = jnp.exp(s - m_new)
            l_sc[h] = alpha * l_sc[h] + jnp.sum(p, axis=-1, keepdims=True)
            m_sc[h] = m_new

            pv = jnp.dot(p.astype(v_h.dtype), v_h,
                         preferred_element_type=jnp.float32)   # (tq, hd)
            pv_parts.append(pv)
            alpha_parts.append(jnp.broadcast_to(alpha, (q_tile, hd)))

        # Single lane-dense (tq, D) read-modify-write per KV step.
        pv_full = jnp.concatenate(pv_parts, axis=-1)
        alpha_full = jnp.concatenate(alpha_parts, axis=-1)
        acc_sc[...] = alpha_full * acc_sc[...] + pv_full

    if causal:
        # Strictly below the diagonal: unmasked path (no iota/select work).
        below = kv * kv_tile + (kv_tile - 1) <= qi * q_tile
        # Diagonal-crossing and not entirely in the future: masked path.
        diag = jnp.logical_and(kv * kv_tile + (kv_tile - 1) > qi * q_tile,
                               kv * kv_tile <= qi * q_tile + (q_tile - 1))
        pl.when(below)(lambda: _update(False))
        pl.when(diag)(lambda: _update(True))
    else:
        _update(False)

    @pl.when(kv == pl.num_programs(2) - 1)
    def _finalize():
        inv_parts = [
            jnp.broadcast_to(pl.reciprocal(l_sc[h], approx=True), (q_tile, hd))
            for h in range(H)
        ]
        inv_full = jnp.concatenate(inv_parts, axis=-1)       # (tq, D)
        o_ref[0, :, :] = (acc_sc[...] * inv_full).astype(o_ref.dtype)


def _attn_footprint(tq, tkv, D, itemsize, num_heads):
    io = 2 * itemsize * (2 * tq * D + 2 * tkv * D)   # double-buffered q,o,k,v
    acc = 4 * tq * D                                 # f32 accumulator slab
    ml = 2 * num_heads * _round_up(tq, 8) * 128 * 4  # m/l scratch (lane-padded)
    return io + acc + ml


def _attn_tiles(T, S, D, itemsize, num_heads):
    """Generation- and D-aware (tq, Tp, tkv, Sp, vmem_limit_bytes)."""
    kind = _device_kind()
    if "v7" in kind:
        budget, cap, scoped = 36 << 20, 56 << 20, 32 << 20
    elif "v6" in kind:
        budget, cap, scoped = 80 << 20, 112 << 20, 32 << 20
    elif "v5" in kind:
        budget, cap, scoped = 48 << 20, 100 << 20, 16 << 20
    else:
        budget, cap, scoped = 36 << 20, 56 << 20, 32 << 20

    candidates = [(256, 512), (256, 256), (128, 256), (128, 128),
                  (64, 128), (32, 64), (16, 32), (8, 8)]
    chosen = None
    for tq_t, tkv_t in candidates:
        tq_c, Tp_c = _tile_for(T, tq_t, 8)
        tkv_c, Sp_c = _tile_for(S, tkv_t, 8)
        fp = _attn_footprint(tq_c, tkv_c, D, itemsize, num_heads)
        if fp <= budget:
            chosen = (tq_c, Tp_c, tkv_c, Sp_c, fp)
            break
    if chosen is None:
        tq_c, Tp_c = _tile_for(T, 8, 8)
        tkv_c, Sp_c = _tile_for(S, 8, 8)
        chosen = (tq_c, Tp_c, tkv_c, Sp_c,
                  _attn_footprint(tq_c, tkv_c, D, itemsize, num_heads))
    tq, Tp, tkv, Sp, fp = chosen
    need = fp + (8 << 20)
    vmem_limit = None if need <= scoped else min(cap, need)
    return tq, Tp, tkv, Sp, vmem_limit


def attention_pallas(q=None, k=None, v=None, *, qkv=None,
                     num_heads, head_dim, causal):
    """Multi-head attention over (B, L, D)-layout activations.

    Either pass separate q (B,T,D) / k,v (B,S,D), or a fused qkv (B,T,3D)
    tensor (self-attention, D % 128 == 0) — the fused path slices Q/K/V as
    last-axis blocks directly in the BlockSpecs, avoiding wrapper copies.
    """
    if qkv is not None:
        B, T, D3 = qkv.shape
        D = D3 // 3
        S = T
        dtype = qkv.dtype
    else:
        B, T, D = q.shape
        S = k.shape[1]
        dtype = q.dtype

    itemsize = jnp.dtype(dtype).itemsize
    tq, Tp, tkv, Sp, vmem_limit = _attn_tiles(T, S, D, itemsize, num_heads)
    s_valid = S if Sp != S else None   # mask padded KV columns in-kernel

    if qkv is not None:
        if Tp != T:
            qkv = jnp.pad(qkv, ((0, 0), (0, Tp - T), (0, 0)))
        operands = (qkv, qkv, qkv)
        q_blk, k_blk, v_blk = 0, 1, 2          # last-axis block index in (B,T,3D)
    else:
        if Tp != T:
            q = jnp.pad(q, ((0, 0), (0, Tp - T), (0, 0)))
        if Sp != S:
            k = jnp.pad(k, ((0, 0), (0, Sp - S), (0, 0)))
            v = jnp.pad(v, ((0, 0), (0, Sp - S), (0, 0)))
        operands = (q, k, v)
        q_blk, k_blk, v_blk = 0, 0, 0

    if causal:
        # Clamp to the last KV block with any unmasked column for this q tile:
        # fully-masked blocks repeat the previous index -> their DMA is skipped.
        def kv_block(i, j):
            return jnp.minimum(j, (i * tq + (tq - 1)) // tkv)
    else:
        def kv_block(i, j):
            return j

    grid = (B, Tp // tq, Sp // tkv)
    kern = partial(_flash_attn_kernel, num_heads=num_heads, head_dim=head_dim,
                   causal=causal, q_tile=tq, kv_tile=tkv, s_valid=s_valid)

    out = pl.pallas_call(
        kern,
        out_shape=jax.ShapeDtypeStruct((B, Tp, D), dtype),
        grid_spec=pltpu.PrefetchScalarGridSpec(
            num_scalar_prefetch=0,
            grid=grid,
            in_specs=[
                pl.BlockSpec((1, tq, D), lambda b, i, j: (b, i, q_blk)),
                pl.BlockSpec((1, tkv, D), lambda b, i, j: (b, kv_block(i, j), k_blk)),
                pl.BlockSpec((1, tkv, D), lambda b, i, j: (b, kv_block(i, j), v_blk)),
            ],
            out_specs=pl.BlockSpec((1, tq, D), lambda b, i, j: (b, i, 0)),
            scratch_shapes=[
                pltpu.VMEM((num_heads, tq, 1), jnp.float32),   # m
                pltpu.VMEM((num_heads, tq, 1), jnp.float32),   # l
                pltpu.VMEM((tq, D), jnp.float32),              # lane-dense acc
            ],
        ),
        compiler_params=pltpu.CompilerParams(
            dimension_semantics=("parallel", "parallel", "arbitrary"),
            vmem_limit_bytes=vmem_limit),
    )(*operands)

    if Tp != T:
        out = out[:, :T, :]
    return out


# ----------------------------------------------------------------------------
# AttentionLayer forward (glue in plain JAX, hot paths in Pallas)
# ----------------------------------------------------------------------------
class AttentionLayerPallas:
    def __init__(self, model_dim, num_heads=8, mask=False, key=None,
                 dtype=jnp.float32):
        assert model_dim % num_heads == 0
        self.model_dim = model_dim
        self.num_heads = num_heads
        self.mask = mask
        self.head_dim = model_dim // num_heads
        self.dtype = dtype

        if key is None:
            key = jax.random.PRNGKey(0)
        ks = jax.random.split(key, 8)
        bound = 1.0 / (model_dim ** 0.5)

        # Weights stored pre-transposed: (Din, Dout), y = x @ W_t + b.
        def w_t(kk):
            w = jax.random.uniform(kk, (model_dim, model_dim), jnp.float32,
                                   -bound, bound)
            return w.astype(dtype)

        def bias(kk):
            b = jax.random.uniform(kk, (model_dim,), jnp.float32, -bound, bound)
            return b.astype(dtype)

        self.Wq_t, self.bq = w_t(ks[0]), bias(ks[1])
        self.Wk_t, self.bk = w_t(ks[2]), bias(ks[3])
        self.Wv_t, self.bv = w_t(ks[4]), bias(ks[5])
        self.Wo_t, self.bo = w_t(ks[6]), bias(ks[7])

        # Fused QKV weight for the self-attention fast path (one matmul).
        self.Wqkv_t = jnp.concatenate([self.Wq_t, self.Wk_t, self.Wv_t], axis=1)
        self.bqkv = jnp.concatenate([self.bq, self.bk, self.bv], axis=0)

    def __call__(self, query, key, value):
        B, T, D = query.shape
        S = key.shape[1]
        H, hd, causal = self.num_heads, self.head_dim, self.mask

        if (query is key) and (key is value):
            # Self-attention: one pass over the activations (fused QKV).
            qkv = linear_pallas(query.reshape(B * T, D), self.Wqkv_t, self.bqkv)
            if D % 128 == 0:
                # Feed the fused (B, T, 3D) tensor straight into the attention
                # kernel; Q/K/V are last-axis D-wide blocks (no wrapper copies).
                ctx = attention_pallas(qkv=qkv.reshape(B, T, 3 * D),
                                       num_heads=H, head_dim=hd, causal=causal)
            else:
                # Lane-unaligned D: D-wide last-axis blocks of a 3D-wide array
                # are illegal, so fall back to (small) wrapper slices.
                q = qkv[:, 0 * D:1 * D].reshape(B, T, D)
                k = qkv[:, 1 * D:2 * D].reshape(B, S, D)
                v = qkv[:, 2 * D:3 * D].reshape(B, S, D)
                ctx = attention_pallas(q, k, v, num_heads=H, head_dim=hd,
                                       causal=causal)
        else:
            # Cross-attention: inputs differ, so three projections are needed.
            q = linear_pallas(query.reshape(B * T, D), self.Wq_t, self.bq).reshape(B, T, D)
            k = linear_pallas(key.reshape(B * S, D), self.Wk_t, self.bk).reshape(B, S, D)
            v = linear_pallas(value.reshape(B * S, D), self.Wv_t, self.bv).reshape(B, S, D)
            ctx = attention_pallas(q, k, v, num_heads=H, head_dim=hd, causal=causal)

        out = linear_pallas(ctx.reshape(B * T, D), self.Wo_t, self.bo).reshape(B, T, D)
        return out


# ----------------------------------------------------------------------------
# Pure-JAX reference (mirrors the PyTorch module) for a correctness check
# ----------------------------------------------------------------------------
def attention_layer_reference(layer, query, key, value):
    H, hd = layer.num_heads, layer.head_dim
    T, S = query.shape[1], key.shape[1]
    q = query @ layer.Wq_t + layer.bq
    k = key @ layer.Wk_t + layer.bk
    v = value @ layer.Wv_t + layer.bv
    qh = jnp.concatenate(jnp.split(q, H, axis=-1), axis=0)
    kh = jnp.concatenate(jnp.split(k, H, axis=-1), axis=0)
    vh = jnp.concatenate(jnp.split(v, H, axis=-1), axis=0)
    s = qh @ jnp.swapaxes(kh, -1, -2) / hd ** 0.5
    if layer.mask:
        m = jnp.tril(jnp.ones((T, S), dtype=bool))
        s = jnp.where(m, s, -jnp.inf)
    p = jax.nn.softmax(s, axis=-1)
    o = p @ vh
    o = jnp.concatenate(jnp.split(o, H, axis=0), axis=-1)
    return o @ layer.Wo_t + layer.bo


if __name__ == "__main__":
    root = jax.random.PRNGKey(0)
    k_q, k_k, k_v, k_p1, k_p2, k_p3, k_q2 = jax.random.split(root, 7)

    # Small shapes consistent with the module: batch=2, seq=8, model_dim=32, heads=8.
    B, T, S, D, H = 2, 8, 8, 32, 8
    query = jax.random.normal(k_q, (B, T, D), jnp.float32)
    key_in = jax.random.normal(k_k, (B, S, D), jnp.float32)
    value_in = jax.random.normal(k_v, (B, S, D), jnp.float32)

    # 1) cross-attention, no mask (three-projection path)
    layer = AttentionLayerPallas(model_dim=D, num_heads=H, mask=False, key=k_p1)
    out = layer(query, key_in, value_in)
    jax.block_until_ready(out)
    ref = attention_layer_reference(layer, query, key_in, value_in)
    assert out.shape == (B, T, D)
    assert bool(jnp.all(jnp.isfinite(out)))
    assert bool(jnp.allclose(out, ref, rtol=2e-2, atol=2e-2)), \
        float(jnp.max(jnp.abs(out - ref)))

    # 2) self-attention with causal mask (fused-QKV + masking; D=32 -> slice fallback)
    layer_m = AttentionLayerPallas(model_dim=D, num_heads=H, mask=True, key=k_p2)
    out_m = layer_m(query, query, query)
    jax.block_until_ready(out_m)
    ref_m = attention_layer_reference(layer_m, query, query, query)
    assert out_m.shape == (B, T, D)
    assert bool(jnp.all(jnp.isfinite(out_m)))
    assert bool(jnp.allclose(out_m, ref_m, rtol=2e-2, atol=2e-2)), \
        float(jnp.max(jnp.abs(out_m - ref_m)))

    # 3) self-attention with causal mask at D=128 (lane-aligned -> fused QKV fed
    #    straight into the attention kernel, no wrapper slicing)
    D2, H2 = 128, 8
    query2 = jax.random.normal(k_q2, (B, T, D2), jnp.float32)
    layer_f = AttentionLayerPallas(model_dim=D2, num_heads=H2, mask=True, key=k_p3)
    out_f = layer_f(query2, query2, query2)
    jax.block_until_ready(out_f)
    ref_f = attention_layer_reference(layer_f, query2, query2, query2)
    assert out_f.shape == (B, T, D2)
    assert bool(jnp.all(jnp.isfinite(out_f)))
    assert bool(jnp.allclose(out_f, ref_f, rtol=2e-2, atol=2e-2)), \
        float(jnp.max(jnp.abs(out_f - ref_f)))

    # 4) bf16 end-to-end smoke test (bf16 MXU inputs, f32 accumulators)
    layer_bf = AttentionLayerPallas(model_dim=D2, num_heads=H2, mask=True,
                                    key=k_p3, dtype=jnp.bfloat16)
    out_bf = layer_bf(query2.astype(jnp.bfloat16),
                      query2.astype(jnp.bfloat16),
                      query2.astype(jnp.bfloat16))
    jax.block_until_ready(out_bf)
    assert out_bf.shape == (B, T, D2)
    assert out_bf.dtype == jnp.bfloat16
    assert bool(jnp.all(jnp.isfinite(out_bf.astype(jnp.float32))))

    print("KERNEL_OK")
</pallas_src>

<mosaic_0001>
module attributes {stable_mosaic.version = 11 : i64} {
  func.func @_linear_kernel(%arg0: i32, %arg1: i32, %arg2: i32, %arg3: memref<16x32xf32, #tpu.memory_space<vmem>>, %arg4: memref<32x32xf32, #tpu.memory_space<vmem>>, %arg5: memref<1x32xf32, #tpu.memory_space<vmem>>, %arg6: memref<16x32xf32, #tpu.memory_space<vmem>>, %arg7: memref<16x32xf32, #tpu.memory_space<vmem>>) attributes {dimension_semantics = [#tpu.dimension_semantics<parallel>, #tpu.dimension_semantics<parallel>, #tpu.dimension_semantics<arbitrary>], iteration_bounds = array<i64: 1, 1, 1>, scalar_prefetch = 0 : i64, scratch_operands = 1 : i64, tpu.core_type = #tpu.core_type<tc>, window_params = [{transform_indices = @transform_0, window_bounds = array<i64: 16, 32>}, {transform_indices = @transform_1, window_bounds = array<i64: 32, 32>}, {transform_indices = @transform_2, window_bounds = array<i64: 1, 32>}, {transform_indices = @transform_3, window_bounds = array<i64: 16, 32>}]} {
    %c0_i32 = arith.constant 0 : i32
    %0 = arith.cmpi eq, %arg2, %c0_i32 : i32
    %1 = arith.extui %0 : i1 to i32
    %c0_i32_0 = arith.constant 0 : i32
    %2 = arith.cmpi ne, %1, %c0_i32_0 : i32
    scf.if %2 {
      %cst_10 = arith.constant 0.000000e+00 : f32
      %12 = vector.broadcast %cst_10 : f32 to vector<16x32xf32>
      %c0_11 = arith.constant 0 : index
      %c0_12 = arith.constant 0 : index
      %13 = vector.load %arg7[%c0_11, %c0_12] : memref<16x32xf32, #tpu.memory_space<vmem>>, vector<16x32xf32>
      tpu.vector_store %arg7[%c0_11, %c0_12], %12 {strides = array<i32>} : memref<16x32xf32, #tpu.memory_space<vmem>>, vector<16x32xf32>,
    } else {
    }
    %c0 = arith.constant 0 : index
    %c0_1 = arith.constant 0 : index
    %3 = vector.load %arg7[%c0, %c0_1] : memref<16x32xf32, #tpu.memory_space<vmem>>, vector<16x32xf32>
    %c0_2 = arith.constant 0 : index
    %c0_3 = arith.constant 0 : index
    %4 = vector.load %arg3[%c0_2, %c0_3] : memref<16x32xf32, #tpu.memory_space<vmem>>, vector<16x32xf32>
    %c0_4 = arith.constant 0 : index
    %c0_5 = arith.constant 0 : index
    %5 = vector.load %arg4[%c0_4, %c0_5] : memref<32x32xf32, #tpu.memory_space<vmem>>, vector<32x32xf32>
    %cst = arith.constant dense<0.000000e+00> : vector<16x32xf32>
    %6 = tpu.matmul %4, %5, %cst {dimension_numbers = #tpu.dot_dimension_numbers<[1], [0], [0], [1], [0, 0, 1, 1], [], []>} : vector<16x32xf32>, vector<32x32xf32>, vector<16x32xf32> -> vector<16x32xf32>
    %7 = arith.addf %3, %6 : vector<16x32xf32>
    %c0_6 = arith.constant 0 : index
    %c0_7 = arith.constant 0 : index
    %8 = vector.load %arg7[%c0_6, %c0_7] : memref<16x32xf32, #tpu.memory_space<vmem>>, vector<16x32xf32>
    tpu.vector_store %arg7[%c0_6, %c0_7], %7 {strides = array<i32>} : memref<16x32xf32, #tpu.memory_space<vmem>>, vector<16x32xf32>,
    %c0_i32_8 = arith.constant 0 : i32
    %9 = arith.cmpi eq, %arg2, %c0_i32_8 : i32
    %10 = arith.extui %9 : i1 to i32
    %c0_i32_9 = arith.constant 0 : i32
    %11 = arith.cmpi ne, %10, %c0_i32_9 : i32
    scf.if %11 {
      %c0_10 = arith.constant 0 : index
      %c0_11 = arith.constant 0 : index
      %12 = vector.load %arg7[%c0_10, %c0_11] : memref<16x32xf32, #tpu.memory_space<vmem>>, vector<16x32xf32>
      %c0_12 = arith.constant 0 : index
      %c0_13 = arith.constant 0 : index
      %13 = vector.load %arg5[%c0_12, %c0_13] : memref<1x32xf32, #tpu.memory_space<vmem>>, vector<1x32xf32>
      %14 = vector.broadcast %13 : vector<1x32xf32> to vector<16x32xf32>
      %15 = arith.addf %12, %14 : vector<16x32xf32>
      %c0_14 = arith.constant 0 : index
      %c0_15 = arith.constant 0 : index
      %16 = vector.load %arg6[%c0_14, %c0_15] : memref<16x32xf32, #tpu.memory_space<vmem>>, vector<16x32xf32>
      tpu.vector_store %arg6[%c0_14, %c0_15], %15 {strides = array<i32>} : memref<16x32xf32, #tpu.memory_space<vmem>>, vector<16x32xf32>,
    } else {
    }
    return
  }
  func.func @transform_0(%arg0: i32, %arg1: i32, %arg2: i32) -> (i32, i32) {
    %c0_i32 = arith.constant 0 : i32
    return %arg0, %arg2 : i32, i32
  }
  func.func @transform_1(%arg0: i32, %arg1: i32, %arg2: i32) -> (i32, i32) {
    %c0_i32 = arith.constant 0 : i32
    return %arg2, %arg1 : i32, i32
  }
  func.func @transform_2(%arg0: i32, %arg1: i32, %arg2: i32) -> (i32, i32) {
    %c0_i32 = arith.constant 0 : i32
    %c0_i32_0 = arith.constant 0 : i32
    return %c0_i32, %arg1 : i32, i32
  }
  func.func @transform_3(%arg0: i32, %arg1: i32, %arg2: i32) -> (i32, i32) {
    %c0_i32 = arith.constant 0 : i32
    return %arg0, %arg1 : i32, i32
  }
}

</mosaic_0001>

<bundles_post_ra>
// kernel: tpu_custom_call.1
= control target key start
LH: loop header
LB: loop body
LE: loop exit
PB: predicated region body
PF: predicated region fallthrough
CT: control target
= control target key end

     0   :  { %8 = vsyncpa [#allocation4], 0  ;;  %s366_s0 = inlined_call_operand.hbm [shape: f32[16,32], index: 0, kind: input, shape index: {}]   ;;  %s367_s1 = inlined_call_operand.hbm [shape: f32[32,32], index: 1, kind: input, shape index: {}]   ;;  %s368_s2 = inlined_call_operand.vmem [shape: f32[1,32], index: 2, kind: input, shape index: {}]   ;;  %s369_s3 = inlined_call_operand.hbm [shape: f32[16,32], index: 3, kind: output, shape index: {}]  }
   0x1   :  { %9 = vsyncpa [#allocation7], 0 }
   0x2   :  { %10 = vsyncpa [#allocation5], 0  ;;  %s284_s12 = smov [#allocation3]   ;;  %s212_s16 = scalar_lea.hbm %s366_s0, 256 }
   0x3   :  { %s16_s13 = sshll.u32 %s284_s12, 4  ;;  %p213_p0 = scmp.ne.s32.totalorder %s366_s0, %s212_s16  ;;  %s17_s13 = int_to_ptr.vmem [resolvable:$true] %s16_s13 }
   0x4   :  { %p216_p1 = scmp.lt.u32.totalorder %s212_s16, %s366_s0 }
   0x6   :  { %p218_p2 = pnand %p216_p1, %p213_p0 }
   0x8   :  { %221 = shalt.err (!%p218_p2)
}
   0x9   :  { %s222_s21 = scalar_lea.vmem %s17_s13, 256  ;;  %p227_p4 = scmp.lt.s32.totalorder %s17_s13, %s17_s13 }
   0xa   :  { %p223_p3 = scmp.ne.s32.totalorder %s17_s13, %s222_s21  ;;  %p228_p5 = scmp.lt.s32.totalorder %s222_s21, %s222_s21 }
   0xc   :  { %p229_p6 = por %p228_p5, %p227_p4 }
   0xe   :  { %p230_p7 = pnand %p229_p6, %p223_p3 }
  0x10   :  { %233 = shalt.err (!%p230_p7)
}
  0x11   :  { %s285_s22 = smov 128   ;;  %s286_s23 = smov 8  }
  0x12   :  { %22 = dma.hbm_to_vmem [thread:$0]  %s366_s0, 256, %s17_s13, [#allocation4], %s285_s22, %s285_s22, %s286_s23  }
  0x13   :  { %s287_s26 = smov [#allocation6]   ;;  %s234_s30 = scalar_lea.hbm %s367_s1, 512 }
  0x14   :  { %s28_s27 = sshll.u32 %s287_s26, 4  ;;  %p235_p8 = scmp.ne.s32.totalorder %s367_s1, %s234_s30  ;;  %s29_s27 = int_to_ptr.vmem [resolvable:$true] %s28_s27 }
  0x15   :  { %p238_p9 = scmp.lt.u32.totalorder %s234_s30, %s367_s1 }
  0x17   :  { %p240_p10 = pnand %p238_p9, %p235_p8 }
  0x19   :  { %243 = shalt.err (!%p240_p10)
}
  0x1a   :  { %s244_s8 = scalar_lea.vmem %s29_s27, 512  ;;  %p249_p12 = scmp.lt.s32.totalorder %s29_s27, %s29_s27 }
  0x1b   :  { %p245_p11 = scmp.ne.s32.totalorder %s29_s27, %s244_s8  ;;  %p250_p13 = scmp.lt.s32.totalorder %s244_s8, %s244_s8 }
  0x1d   :  { %p251_p0 = por %p250_p13, %p249_p12 }
  0x1f   :  { %p252_p1 = pnand %p251_p0, %p245_p11 }
  0x21   :  { %255 = shalt.err (!%p252_p1)
}
  0x22   :  { %34 = dma.hbm_to_vmem [thread:$0]  %s367_s1, 512, %s29_s27, [#allocation7], %s285_s22, %s285_s22, %s286_s23  }
  0x23   :  { %278 = dma.done.wait [#allocation4], 256  }
  0x24   :  { %279 = vsyncadd [#allocation4], 4294967040 }
  0x25   :  { %280 = dma.done.wait [#allocation7], 512  }
  0x26   :  { %281 = vsyncadd [#allocation7], 4294966784  ;;  %vm47_vm0 = vcmask 261120   ;;  %v288_v0 = vmov 0.0   ;;  %v54_v1 = vld [vmem:[#allocation6] sm:$0xff]  ;;  %v55_v2 = vld [vmem:[#allocation6 + $0x8] sm:$0xff] }
  0x27   :  { %49 = vst.msk [vmem:[#allocation2 + $0x8] sm:$0xff] %vm47_vm0, %v288_v0  ;;  %48 = vst.msk [vmem:[#allocation2] sm:$0xff] %vm47_vm0, %v288_v0  ;;  %v56_v3 = vld [vmem:[#allocation6 + $0x10] sm:$0xff]  ;;  %v198_v4 = vpack.c.bf16 %v55_v2, %v54_v1  ;;  %v57_v5 = vld [vmem:[#allocation6 + $0x18] sm:$0xff]  ;;  %s289_s11 = smov [#allocation8]  }
  0x28   :  { %v52_v6 = vld [vmem:[#allocation3] sm:$0xff]  ;;  %v202_v7 = vpack.c.bf16 %v57_v5, %v56_v3  ;;  %v53_v8 = vld [vmem:[#allocation3 + $0x8] sm:$0xff]  ;;  %v180_v15 = vld [vmem:[%s368_s2] ss:$0 sm:$0xff]  ;;  %s165_s12 = sshll.u32 %s289_s11, 4  ;;  %s166_s12 = int_to_ptr.vmem [resolvable:$true] %s165_s12 }
  0x29   :  { %195 = vmatprep.mubr.msk.f32.mxu0 %vm47_vm0, %v52_v6  ;;  %199 = vmatprep.subr.bf16.mxu0 %v198_v4  ;;  %s256_s13 = scalar_lea.vmem %s166_s12, 256  ;;  %p261_p3 = scmp.lt.s32.totalorder %s166_s12, %s166_s12 }
  0x2a   :  { %201 = vmatpush3.bf16.msra.mxu0 %v198_v4  ;;  %p257_p2 = scmp.ne.s32.totalorder %s166_s12, %s256_s13  ;;  %p262_p4 = scmp.lt.s32.totalorder %s256_s13, %s256_s13 }
  0x2b   :  { %203 = vmatprep.subr.bf16.mxu0 %v202_v7 }
  0x2c   :  { %p263_p5 = por %p262_p4, %p261_p3 }
  0x2e   :  { %205 = vmatpush3.bf16.msra.mxu0 %v202_v7  ;;  %v51_v9 = vld [vmem:[#allocation2 + $0x8] sm:$0xff]  ;;  %v50_v10 = vld [vmem:[#allocation2] sm:$0xff]  ;;  %p264_p6 = pnand %p263_p5, %p257_p2 }
  0x31   :  { %196 = vmatmul.mubr.msk.f32.vlgmr.msra.gmra.mrb[0].mxu0 %vm47_vm0, %v53_v8 }
 0x104   :  { %v197_v11 = vpop.f32.mrb[0].mxu0 }
 0x105   :  { %v141_v12 = vadd.f32 %v197_v11, %v51_v9  ;;  %v131_v13 = vpop.f32.mrb[1].mxu0 }
 0x106   :  { %v140_v14 = vadd.f32 %v131_v13, %v50_v10 }
 0x107   :  { %143 = vst.msk [vmem:[#allocation2 + $0x8] sm:$0xff] %vm47_vm0, %v141_v12 }
 0x108   :  { %142 = vst.msk [vmem:[#allocation2] sm:$0xff] %vm47_vm0, %v140_v14 }
 0x10e   :  { %v148_v16 = vld [vmem:[#allocation2 + $0x8] sm:$0xff] }
 0x10f   :  { %v147_v17 = vld [vmem:[#allocation2] sm:$0xff]  ;;  %v157_v18 = vadd.f32 %v180_v15, %v148_v16 }
 0x110   :  { %v156_v19 = vadd.f32 %v180_v15, %v147_v17 }
 0x111   :  { %159 = vst.msk [vmem:[#allocation8 + $0x8] sm:$0xff] %vm47_vm0, %v157_v18 }
 0x112   :  { %158 = vst.msk [vmem:[#allocation8] sm:$0xff] %vm47_vm0, %v156_v19 }
 0x113   :  { %267 = shalt.err (!%p264_p6)
}
 0x114   :  { %s268_s15 = scalar_lea.hbm %s369_s3, 256 }
 0x115   :  { %p269_p7 = scmp.ne.s32.totalorder %s369_s3, %s268_s15  ;;  %p272_p8 = scmp.lt.u32.totalorder %s268_s15, %s369_s3 }
 0x117   :  { %p274_p9 = pnand %p272_p8, %p269_p7 }
 0x119   :  { %277 = shalt.err (!%p274_p9)
}
 0x11a   :  { %171 = dma.vmem_to_hbm [thread:$0]  %s166_s12, 256, %s369_s3, [#allocation5], %s285_s22, %s285_s22, %s286_s23  }
 0x11b   :  { %282 = dma.done.wait [#allocation5], 256  }
 0x11c   :  { %283 = vsyncadd [#allocation5], 4294967040 }
 0x11d   :  { %175 = vsyncpa [#allocation4], 1 }
 0x11e   :  { %176 = vsyncpa [#allocation7], 1 }
 0x11f   :  { %177 = vsyncpa [#allocation5], 1 }

</bundles_post_ra>
